<compile_context>
chip_gen: v7x
topology: tpu7x:2x2x1
jax: 0.10.0
libtpu: 0.0.40
codegen_flags: <defaults>
</compile_context>

<pallas_src>
import functools

import jax
import jax.numpy as jnp
from jax.experimental import pallas as pl
from jax.experimental.pallas import tpu as pltpu

HID_LANES = 128      # padded hidden width (hidden + ones-carry lane), one vreg lane span
SUBLANE = 16         # batch-tile sublane multiple (bf16 packs 16 rows / vreg)


def linear_encoder_kernel(xa_ref, lab_ref, w1_ref, w2_ref, out_ref, *, latent):
    """Two MXU matmuls + ReLU + per-row squared error.

    xa_ref : [tb, d_in+1]   cols [0:d_in]=x, col d_in = 1.0 (bias carry)   (bf16 or f32)
    lab_ref: [tb, 1]        f32 labels
    w1_ref : [d_in+1, 128]  rows [0:d_in]=w1, row d_in = [b1 | 1.0 carry]
    w2_ref : [128, L_OUT]   cols [0:L]=w2(+b2 row), col L = fused fc head (+its bias)
    out_ref: [tb, L_OUT]    cols [0:L]=enc, col L=out, col L+1=(out-label)^2, rest 0
    """
    xa = xa_ref[...]                                                     # [tb, d_in+1]

    # layer 1: x @ w1 + b1 (bias folded via the ones lane); ReLU keeps the carry lane at 1.
    h = jnp.dot(xa, w1_ref[...], preferred_element_type=jnp.float32)     # [tb, 128]
    h = jnp.maximum(h, 0.0).astype(w2_ref.dtype)

    # layer 2 (+ fused fc head): cols [0:L]=enc, col L = enc @ wfc^T + bfc
    y = jnp.dot(h, w2_ref[...], preferred_element_type=jnp.float32)      # [tb, L_OUT]

    # per-row squared error against the (f32) labels
    sq = (y[:, latent:latent + 1] - lab_ref[...]) ** 2                   # [tb, 1]

    lane = jax.lax.broadcasted_iota(jnp.int32, y.shape, 1)
    out_ref[...] = jnp.where(lane == latent + 1, sq, y)                  # single store


def linear_encoder_forward(x, label_ids, params, *, dtype=jnp.bfloat16, block_b=None):
    """Full LinearEncoder forward in one pallas_call.

    params: w1 [D_in,H], b1 [1,H], w2 [H,L], b2 [1,L], wfc [1,L], bfc [1,1]
    Returns (encoder [B,L], out [B,1], loss scalar) — all f32 values.
    """
    f32 = jnp.float32
    B, d_in = x.shape
    H = params["w1"].shape[1]
    L = params["w2"].shape[1]
    assert H + 1 <= HID_LANES, "hidden dim (+carry) must fit in 128 lanes"
    l_out = -(-(L + 2) // 8) * 8                     # output lanes: enc | out | sq, padded to 8
    assert l_out <= 128, "latent dim (+2) must fit in 128 lanes"

    # --- batch tiling: multiple of 16 sublanes, big tiles, >=2 grid steps when possible ---
    b_rounded = -(-B // SUBLANE) * SUBLANE
    if block_b is None:
        block_b = 8192 if dtype == jnp.bfloat16 else 4096
    block_b = max(SUBLANE, (min(block_b, b_rounded) // SUBLANE) * SUBLANE)
    if b_rounded >= 2 * SUBLANE and block_b > b_rounded // 2:
        block_b = max(SUBLANE, ((b_rounded // 2) // SUBLANE) * SUBLANE)   # v7x: feed both TCs
    Bp = -(-b_rounded // block_b) * block_b
    grid = (Bp // block_b,)

    # --- activation slab [Bp, d_in+1] = (x | ones), single concat + pad (no .at[].set) ---
    xa = jnp.concatenate([x.astype(dtype), jnp.ones((B, 1), dtype)], axis=1)
    xa = jnp.pad(xa, ((0, Bp - B), (0, 0)))
    lab = jnp.pad(label_ids.reshape(B, 1).astype(f32), ((0, Bp - B), (0, 0)))

    # --- weight slab 1: [d_in+1, 128]  (w1 stacked over [b1 | carry=1], lane-padded) ---
    w1 = params["w1"].astype(f32)
    b1 = params["b1"].reshape(1, H).astype(f32)
    w1p = jnp.concatenate(
        [jnp.concatenate([w1, jnp.zeros((d_in, 1), f32)], axis=1),
         jnp.concatenate([b1, jnp.ones((1, 1), f32)], axis=1)], axis=0)          # [d_in+1, H+1]
    w1p = jnp.pad(w1p, ((0, 0), (0, HID_LANES - (H + 1)))).astype(dtype)         # [d_in+1, 128]

    # --- weight slab 2: [128, L_OUT]  (w2 | fused fc head), bias row at the carry lane ---
    w2 = params["w2"].astype(f32)
    b2 = params["b2"].reshape(1, L).astype(f32)
    wfc = params["wfc"].reshape(L, 1).astype(f32)
    bfc = params["bfc"].reshape(1, 1).astype(f32)
    w2_head = jnp.dot(w2, wfc)                                                   # [H, 1]
    b2_head = jnp.dot(b2, wfc) + bfc                                             # [1, 1]
    w2p = jnp.concatenate(
        [jnp.concatenate([w2, w2_head], axis=1),
         jnp.concatenate([b2, b2_head], axis=1)], axis=0)                        # [H+1, L+1]
    w2p = jnp.pad(w2p, ((0, HID_LANES - (H + 1)), (0, l_out - (L + 1)))).astype(dtype)

    out_slab = pl.pallas_call(
        functools.partial(linear_encoder_kernel, latent=L),
        out_shape=jax.ShapeDtypeStruct((Bp, l_out), jnp.float32),
        grid_spec=pltpu.PrefetchScalarGridSpec(
            num_scalar_prefetch=0,
            grid=grid,
            in_specs=[
                pl.BlockSpec((block_b, d_in + 1), lambda i: (i, 0)),   # activations (tiled)
                pl.BlockSpec((block_b, 1), lambda i: (i, 0)),          # f32 labels (tiled)
                pl.BlockSpec((d_in + 1, HID_LANES), lambda i: (0, 0)),  # W1 slab (resident)
                pl.BlockSpec((HID_LANES, l_out), lambda i: (0, 0)),     # W2 slab (resident)
            ],
            out_specs=pl.BlockSpec((block_b, l_out), lambda i: (i, 0)),
        ),
        compiler_params=pltpu.CompilerParams(dimension_semantics=("parallel",)),
    )(xa, lab, w1p, w2p)

    enc = out_slab[:B, :L]
    out = out_slab[:B, L:L + 1]
    loss = jnp.mean(out_slab[:B, L + 1])     # mean of per-row squared errors (padded rows excluded)
    return enc, out, loss


def init_params(key, input_dim, hidden_dim, latent_dim):
    """Deterministic synthetic init (PyTorch-style uniform ranges), weights stored [in, out]."""
    ks = jax.random.split(key, 6)

    def unif(k, shape, fan_in):
        bound = 1.0 / jnp.sqrt(fan_in)
        return jax.random.uniform(k, shape, jnp.float32, -bound, bound)

    return {
        "w1": unif(ks[0], (input_dim, hidden_dim), input_dim),
        "b1": unif(ks[1], (1, hidden_dim), input_dim),
        "w2": unif(ks[2], (hidden_dim, latent_dim), hidden_dim),
        "b2": unif(ks[3], (1, latent_dim), hidden_dim),
        "wfc": unif(ks[4], (1, latent_dim), latent_dim),
        "bfc": unif(ks[5], (1, 1), latent_dim),
    }


if __name__ == "__main__":
    B, input_dim, hidden_dim, latent_dim = 8, 32, 64, 16

    key = jax.random.PRNGKey(0)
    k_x, k_lbl, k_p = jax.random.split(key, 3)

    x = jax.random.normal(k_x, (B, input_dim), jnp.float32)
    label_ids = jax.random.normal(k_lbl, (B, 1), jnp.float32)
    params = init_params(k_p, input_dim, hidden_dim, latent_dim)

    # Pure-JAX f32 reference (highest precision matmuls).
    hp = jax.lax.Precision.HIGHEST
    h_ref = jnp.maximum(jnp.dot(x, params["w1"], precision=hp) + params["b1"], 0.0)
    enc_ref = jnp.dot(h_ref, params["w2"], precision=hp) + params["b2"]
    out_ref = jnp.dot(enc_ref, params["wfc"].T, precision=hp) + params["bfc"]
    loss_ref = jnp.mean((out_ref - label_ids) ** 2)

    # f32 operand path: tight parity with the reference.
    enc32, out32, loss32 = linear_encoder_forward(x, label_ids, params, dtype=jnp.float32)
    jax.block_until_ready((enc32, out32, loss32))
    assert enc32.shape == (B, latent_dim) and out32.shape == (B, 1) and loss32.shape == ()
    assert jnp.allclose(enc32, enc_ref, atol=1e-3, rtol=1e-3)
    assert jnp.allclose(out32, out_ref, atol=1e-3, rtol=1e-3)
    assert jnp.allclose(loss32, loss_ref, atol=1e-3, rtol=1e-3)

    # bf16 operand path (the performance configuration): looser numeric tolerance.
    enc16, out16, loss16 = linear_encoder_forward(x, label_ids, params, dtype=jnp.bfloat16)
    jax.block_until_ready((enc16, out16, loss16))
    assert enc16.shape == (B, latent_dim) and out16.shape == (B, 1) and loss16.shape == ()
    assert jnp.allclose(enc16, enc_ref, atol=5e-2, rtol=5e-2)
    assert jnp.allclose(out16, out_ref, atol=5e-2, rtol=5e-2)
    assert jnp.allclose(loss16, loss_ref, atol=5e-2, rtol=5e-2)

    print("KERNEL_OK")
</pallas_src>

<mosaic_0001>
module attributes {stable_mosaic.version = 11 : i64} {
  func.func @linear_encoder_kernel(%arg0: i32, %arg1: memref<16x33xf32, #tpu.memory_space<vmem>>, %arg2: memref<16x1xf32, #tpu.memory_space<vmem>>, %arg3: memref<33x128xf32, #tpu.memory_space<vmem>>, %arg4: memref<128x24xf32, #tpu.memory_space<vmem>>, %arg5: memref<16x24xf32, #tpu.memory_space<vmem>>) attributes {dimension_semantics = [#tpu.dimension_semantics<parallel>], iteration_bounds = array<i64: 1>, scalar_prefetch = 0 : i64, scratch_operands = 0 : i64, tpu.core_type = #tpu.core_type<tc>, window_params = [{transform_indices = @transform_0, window_bounds = array<i64: 16, 33>}, {transform_indices = @transform_1, window_bounds = array<i64: 16, 1>}, {pipeline_mode = #tpu.pipeline_mode<synchronous>, transform_indices = @transform_2, window_bounds = array<i64: 33, 128>}, {pipeline_mode = #tpu.pipeline_mode<synchronous>, transform_indices = @transform_3, window_bounds = array<i64: 128, 24>}, {transform_indices = @transform_4, window_bounds = array<i64: 16, 24>}]} {
    %c0 = arith.constant 0 : index
    %c0_0 = arith.constant 0 : index
    %0 = vector.load %arg1[%c0, %c0_0] : memref<16x33xf32, #tpu.memory_space<vmem>>, vector<16x33xf32>
    %c0_1 = arith.constant 0 : index
    %c0_2 = arith.constant 0 : index
    %1 = vector.load %arg3[%c0_1, %c0_2] : memref<33x128xf32, #tpu.memory_space<vmem>>, vector<33x128xf32>
    %cst = arith.constant dense<0.000000e+00> : vector<16x128xf32>
    %2 = tpu.matmul %0, %1, %cst {dimension_numbers = #tpu.dot_dimension_numbers<[1], [0], [0], [1], [0, 0, 1, 1], [], []>} : vector<16x33xf32>, vector<33x128xf32>, vector<16x128xf32> -> vector<16x128xf32>
    %cst_3 = arith.constant 0.000000e+00 : f32
    %3 = vector.broadcast %cst_3 : f32 to vector<16x128xf32>
    %4 = arith.maximumf %2, %3 : vector<16x128xf32>
    %c0_4 = arith.constant 0 : index
    %c0_5 = arith.constant 0 : index
    %5 = vector.load %arg4[%c0_4, %c0_5] : memref<128x24xf32, #tpu.memory_space<vmem>>, vector<128x24xf32>
    %cst_6 = arith.constant dense<0.000000e+00> : vector<16x24xf32>
    %6 = tpu.matmul %4, %5, %cst_6 {dimension_numbers = #tpu.dot_dimension_numbers<[1], [0], [0], [1], [0, 0, 1, 1], [], []>} : vector<16x128xf32>, vector<128x24xf32>, vector<16x24xf32> -> vector<16x24xf32>
    %7 = vector.extract_strided_slice %6 {offsets = [0, 16], sizes = [16, 1], strides = [1, 1]} : vector<16x24xf32> to vector<16x1xf32>
    %c0_7 = arith.constant 0 : index
    %c0_8 = arith.constant 0 : index
    %8 = vector.load %arg2[%c0_7, %c0_8] : memref<16x1xf32, #tpu.memory_space<vmem>>, vector<16x1xf32>
    %9 = arith.subf %7, %8 : vector<16x1xf32>
    %10 = arith.mulf %9, %9 : vector<16x1xf32>
    %11 = tpu.iota {dimensions = array<i32: 1>} : vector<16x24xi32>
    %c17_i32 = arith.constant 17 : i32
    %12 = vector.broadcast %c17_i32 : i32 to vector<16x24xi32>
    %13 = arith.cmpi eq, %11, %12 : vector<16x24xi32>
    %14 = vector.shape_cast %10 : vector<16x1xf32> to vector<16x1xf32>
    %15 = vector.broadcast %14 : vector<16x1xf32> to vector<16x24xf32>
    %16 = arith.select %13, %15, %6 : vector<16x24xi1>, vector<16x24xf32>
    %c0_9 = arith.constant 0 : index
    %c0_10 = arith.constant 0 : index
    %17 = vector.load %arg5[%c0_9, %c0_10] : memref<16x24xf32, #tpu.memory_space<vmem>>, vector<16x24xf32>
    tpu.vector_store %arg5[%c0_9, %c0_10], %16 {strides = array<i32>} : memref<16x24xf32, #tpu.memory_space<vmem>>, vector<16x24xf32>,
    return
  }
  func.func @transform_0(%arg0: i32) -> (i32, i32) {
    %c0_i32 = arith.constant 0 : i32
    %c0_i32_0 = arith.constant 0 : i32
    return %arg0, %c0_i32 : i32, i32
  }
  func.func @transform_1(%arg0: i32) -> (i32, i32) {
    %c0_i32 = arith.constant 0 : i32
    %c0_i32_0 = arith.constant 0 : i32
    return %arg0, %c0_i32 : i32, i32
  }
  func.func @transform_2(%arg0: i32) -> (i32, i32) {
    %c0_i32 = arith.constant 0 : i32
    %c0_i32_0 = arith.constant 0 : i32
    %c0_i32_1 = arith.constant 0 : i32
    return %c0_i32, %c0_i32_0 : i32, i32
  }
  func.func @transform_3(%arg0: i32) -> (i32, i32) {
    %c0_i32 = arith.constant 0 : i32
    %c0_i32_0 = arith.constant 0 : i32
    %c0_i32_1 = arith.constant 0 : i32
    return %c0_i32, %c0_i32_0 : i32, i32
  }
  func.func @transform_4(%arg0: i32) -> (i32, i32) {
    %c0_i32 = arith.constant 0 : i32
    %c0_i32_0 = arith.constant 0 : i32
    return %arg0, %c0_i32 : i32, i32
  }
}

</mosaic_0001>

<bundles_post_ra>
// kernel: tpu_custom_call.1
= control target key start
LH: loop header
LB: loop body
LE: loop exit
PB: predicated region body
PF: predicated region fallthrough
CT: control target
= control target key end

     0   :  { %vm25_vm0 = vcmask 269312   ;;  %vm32_vm1 = vcmask 1040384   ;;  %s518_s0 = inlined_call_operand.vmem [shape: f32[16,33], index: 0, kind: input, shape index: {}]   ;;  %s519_s1 = inlined_call_operand.vmem [shape: f32[16,1], index: 1, kind: input, shape index: {}]   ;;  %s520_s2 = inlined_call_operand.vmem [shape: f32[33,128], index: 2, kind: input, shape index: {}]   ;;  %s521_s3 = inlined_call_operand.vmem [shape: f32[128,24], index: 3, kind: input, shape index: {}]   ;;  %s522_s4 = inlined_call_operand.hbm [shape: f32[16,24], index: 4, kind: output, shape index: {}]  }
   0x1   :  { %v20_v0 = vld [vmem:[%s520_s2] sm:$0xff]  ;;  %v21_v1 = vld [vmem:[%s520_s2 + $0x8] sm:$0xff]  ;;  %v22_v2 = vld [vmem:[%s520_s2 + $0x10] sm:$0xff] }
   0x2   :  { %v328_v3 = vpack.c.bf16 %v21_v1, %v20_v0  ;;  %v23_v4 = vld [vmem:[%s520_s2 + $0x18] sm:$0xff]  ;;  %v18_v5 = vld [vmem:[%s518_s0] sm:$0xff]  ;;  %v114_v8 = vld [vmem:[%s521_s3 + $0x8] sm:$0xff] }
   0x3   :  { %v332_v6 = vpack.c.bf16 %v23_v4, %v22_v2  ;;  %290 = vmatprep.mubr.msk.f32.mxu0 %vm25_vm0, %v18_v5  ;;  %v113_v7 = vld [vmem:[%s521_s3] sm:$0xff]  ;;  %v115_v10 = vld [vmem:[%s521_s3 + $0x10] sm:$0xff]  ;;  %v116_v11 = vld [vmem:[%s521_s3 + $0x18] sm:$0xff] }
   0x4   :  { %329 = vmatprep.subr.bf16.mxu0 %v328_v3  ;;  %v336_v9 = vpack.c.bf16 %v114_v8, %v113_v7  ;;  %v340_v12 = vpack.c.bf16 %v116_v11, %v115_v10  ;;  %v117_v13 = vld [vmem:[%s521_s3 + $0x20] sm:$0xff]  ;;  %v118_v14 = vld [vmem:[%s521_s3 + $0x28] sm:$0xff] }
   0x5   :  { %331 = vmatpush3.bf16.msra.mxu0 %v328_v3  ;;  %v24_v15 = vld [vmem:[%s520_s2 + $0x20] sm:$0x1]  ;;  %v344_v16 = vpack.c.bf16 %v118_v14, %v117_v13 }
   0x6   :  { %333 = vmatprep.subr.bf16.mxu0 %v332_v6  ;;  %337 = vmatprep.subr.bf16.mxu1 %v336_v9 }
   0x7   :  { %339 = vmatpush3.bf16.msra.mxu1 %v336_v9 }
   0x8   :  { %341 = vmatprep.subr.bf16.mxu1 %v340_v12 }
   0x9   :  { %9 = vsyncpa [#allocation3], 0  ;;  %335 = vmatpush3.bf16.msra.mxu0 %v332_v6  ;;  %v119_v17 = vld [vmem:[%s521_s3 + $0x30] sm:$0xff]  ;;  %v120_v18 = vld [vmem:[%s521_s3 + $0x38] sm:$0xff]  ;;  %s399_s9 = smov 16   ;;  %v400_v39 = vmov 16   ;;  %v218_v48 = vlaneseq }
   0xa   :  { %288 = vmatprep.subr.msk.mxu0 %vm32_vm1, %v24_v15  ;;  %v19_v19 = vld [vmem:[%s518_s0 + $0x8] sm:$0xff]  ;;  %v348_v20 = vpack.c.bf16 %v120_v18, %v119_v17  ;;  %v121_v21 = vld [vmem:[%s521_s3 + $0x40] sm:$0xff]  ;;  %v123_v24 = vld [vmem:[%s521_s3 + $0x50] sm:$0xff]  ;;  %373 = vset.pattern.permute.xlu1 %v400_v39  ;;  %vm233_vm3 = vcmask 195584  }
   0xb   :  { %343 = vmatpush3.bf16.msra.mxu1 %v340_v12  ;;  %v122_v22 = vld [vmem:[%s521_s3 + $0x48] sm:$0xff]  ;;  %v124_v25 = vld [vmem:[%s521_s3 + $0x58] sm:$0xff]  ;;  %v125_v27 = vld [vmem:[%s521_s3 + $0x60] sm:$0xff]  ;;  %374 = vset.pattern.permute.xlu0 %v400_v39  ;;  %v219_v49 = vand.u32 127, %v218_v48 }
   0xc   :  { %345 = vmatprep.subr.bf16.mxu1 %v344_v16  ;;  %v352_v23 = vpack.c.bf16 %v122_v22, %v121_v21  ;;  %v356_v26 = vpack.c.bf16 %v124_v25, %v123_v24  ;;  %v126_v28 = vld [vmem:[%s521_s3 + $0x68] sm:$0xff]  ;;  %v127_v30 = vld [vmem:[%s521_s3 + $0x70] sm:$0xff]  ;;  %v128_v31 = vld [vmem:[%s521_s3 + $0x78] sm:$0xff] }
   0xd   :  { %289 = vmatpush3.msk.msra.mxu0 %vm32_vm1, %v24_v15  ;;  %v360_v29 = vpack.c.bf16 %v126_v28, %v125_v27  ;;  %v364_v32 = vpack.c.bf16 %v128_v31, %v127_v30  ;;  %v204_v33 = vld [vmem:[%s519_s1] sm:$0xff]  ;;  %v205_v34 = vld [vmem:[%s519_s1 + $0x8] sm:$0xff]  ;;  %vm220_vm2 = vcmp.eq.s32.totalorder %v219_v49, 17  ;;  %s401_s1 = smov [#allocation2]  }
   0xe   :  { %291 = vmatmul.mubr.msk.f32.vlgmr.msra.gmra.mrb[0].mxu0 %vm25_vm0, %v19_v19  ;;  %208 = vrot.lane.b32.xlu0 %v204_v33, %s399_s9  ;;  %s241_s3 = sshll.u32 %s401_s1, 4  ;;  %s242_s3 = int_to_ptr.vmem [resolvable:$true] %s241_s3 }
   0xf   :  { %347 = vmatpush3.bf16.msra.mxu1 %v344_v16  ;;  %s375_s12 = scalar_lea.vmem %s242_s3, 256  ;;  %p380_p1 = scmp.lt.s32.totalorder %s242_s3, %s242_s3 }
  0x10   :  { %349 = vmatprep.subr.bf16.mxu1 %v348_v20  ;;  %p376_p0 = scmp.ne.s32.totalorder %s242_s3, %s375_s12  ;;  %p381_p2 = scmp.lt.s32.totalorder %s375_s12, %s375_s12 }
  0x12   :  { %210 = vrot.lane.b32.xlu0 %v205_v34, %s399_s9  ;;  %p382_p3 = por %p381_p2, %p380_p1 }
  0x13   :  { %351 = vmatpush3.bf16.msra.mxu1 %v348_v20 }
  0x14   :  { %353 = vmatprep.subr.bf16.mxu1 %v352_v23  ;;  %p383_p4 = pnand %p382_p3, %p376_p0 }
  0x17   :  { %355 = vmatpush3.bf16.msra.mxu1 %v352_v23 }
  0x18   :  { %357 = vmatprep.subr.bf16.mxu1 %v356_v26 }
  0x1b   :  { %359 = vmatpush3.bf16.msra.mxu1 %v356_v26 }
  0x1c   :  { %361 = vmatprep.subr.bf16.mxu1 %v360_v29 }
  0x1f   :  { %363 = vmatpush3.bf16.msra.mxu1 %v360_v29 }
  0x20   :  { %365 = vmatprep.subr.bf16.mxu1 %v364_v32 }
  0x23   :  { %367 = vmatpush3.bf16.msra.mxu1 %v364_v32 }
  0x80   :  { %v209_v40 = vpop.permute.xlu0 %208 }
  0x84   :  { %v211_v42 = vpop.permute.xlu0 %210 }
  0xe1   :  { %v292_v35 = vpop.f32.mrb[0].mxu0 }
  0xe2   :  { %v102_v36 = vpop.f32.mrb[1].mxu0  ;;  %v112_v38 = vmax.f32 %v292_v35, 0.0 }
  0xe3   :  { %v111_v37 = vmax.f32 %v102_v36, 0.0 }
  0xe5   :  { %325 = vmatprep.mubr.f32.mxu1 %v111_v37 }
  0xe6   :  { %326 = vmatmul.mubr.f32.vlgmr.msra.gmra.mrb[0].mxu1 %v112_v38 }
 0x1b9   :  { %v327_v41 = vpop.f32.mrb[0].mxu1 }
 0x1ba   :  { %v195_v43 = vpop.f32.mrb[1].mxu1  ;;  %v215_v45 = vsub.f32 %v327_v41, %v211_v42 }
 0x1bb   :  { %v214_v44 = vsub.f32 %v195_v43, %v209_v40 }
 0x1bc   :  { %v217_v47 = vmul.f32 %v215_v45, %v215_v45 }
 0x1bd   :  { %v216_v46 = vmul.f32 %v214_v44, %v214_v44 }
 0x1bf   :  { %223 = vperm.xlu1 %373, %v216_v46  }
 0x1c3   :  { %228 = vperm.xlu1 %373, %v217_v47  }
 0x23e   :  { %v224_v50 = vpop.permute.xlu1 %223 }
 0x23f   :  { %v231_v51 = vsel %vm220_vm2, %v224_v50, %v195_v43 }
 0x240   :  { %234 = vst.msk [vmem:[#allocation2] sm:$0xff] %vm233_vm3, %v231_v51 }
 0x242   :  { %v229_v52 = vpop.permute.xlu1 %228 }
 0x243   :  { %v232_v53 = vsel %vm220_vm2, %v229_v52, %v327_v41 }
 0x244   :  { %235 = vst.msk [vmem:[#allocation2 + $0x8] sm:$0xff] %vm233_vm3, %v232_v53 }
 0x245   :  { %386 = shalt.err (!%p383_p4)
}
 0x246   :  { %s387_s15 = scalar_lea.hbm %s522_s4, 256 }
 0x247   :  { %p388_p5 = scmp.ne.s32.totalorder %s522_s4, %s387_s15  ;;  %p391_p6 = scmp.lt.u32.totalorder %s387_s15, %s522_s4 }
 0x249   :  { %p393_p7 = pnand %p391_p6, %p388_p5 }
 0x24b   :  { %396 = shalt.err (!%p393_p7)
}
 0x24c   :  { %s402_s19 = smov 128   ;;  %s403_s20 = smov 8  }
 0x24d   :  { %247 = dma.vmem_to_hbm [thread:$0]  %s242_s3, 256, %s522_s4, [#allocation3], %s402_s19, %s402_s19, %s403_s20  }
 0x24e   :  { %397 = dma.done.wait [#allocation3], 256  }
 0x24f   :  { %398 = vsyncadd [#allocation3], 4294967040 }
 0x250   :  { %251 = vsyncpa [#allocation3], 1 }

</bundles_post_ra>
